<compile_context>
chip_gen: v5e
topology: v5e:2x2
jax: 0.10.0
libtpu: 0.0.40
codegen_flags: <defaults>
</compile_context>

<pallas_src>
import functools

import jax
import jax.numpy as jnp
from jax.experimental import pallas as pl
from jax.experimental.pallas import tpu as pltpu


# Scoped-VMEM limit: big enough for double-buffered ViT-B per-layer weights
# (~28 MB bf16) plus activations, but leaves headroom on v7x (64 MiB physical).
_VMEM_LIMIT_BYTES = 56 * 1024 * 1024


# ----------------------------- math helpers -----------------------------------


def _layernorm(x, g, b, eps=1e-6):
    # f32 VPU math (matches torch LayerNorm: biased variance, eps=1e-6 in timm ViT).
    mu = jnp.mean(x, axis=-1, keepdims=True)
    xc = x - mu
    var = jnp.mean(xc * xc, axis=-1, keepdims=True)
    return xc * jax.lax.rsqrt(var + eps) * g + b


# ----------------------------- kernels -----------------------------------------


def patch_embed_kernel(patches_ref, w_ref, b_ref, o_ref):
    # (rt, C*p*p) @ (C*p*p, D) + (1, D) == Conv2d(kernel=p, stride=p) patch embed.
    o_ref[...] = (
        jnp.dot(
            patches_ref[...].astype(jnp.bfloat16),
            w_ref[...],
            preferred_element_type=jnp.float32,
        )
        + b_ref[...]
    )


def encoder_layer_kernel(
    x_ref,
    ln1_g_ref, ln1_b_ref, wqkv_ref, bqkv_ref, wo_ref, bo_ref,
    ln2_g_ref, ln2_b_ref, w1_ref, b1_ref, w2_ref, b2_ref,
    o_ref,
    ctx_sc,
    *, num_heads, head_dim, seq_real,
):
    # grid = (batch, layer); layer is the innermost ("arbitrary") axis.
    # o_ref is the (1, S_pad, D) residual block; its index_map is constant across
    # the layer axis, so it stays resident in VMEM across all layers of a batch
    # element and is only written back to HBM when the batch index changes.
    S_pad, D = ctx_sc.shape
    layer = pl.program_id(1)

    @pl.when(layer == 0)
    def _():
        o_ref[...] = x_ref[...]          # initialize residual from embedded tokens

    x = o_ref[0]                          # (S_pad, D) f32 residual

    # Per-layer weights (DMA'd per grid step; layer l+1 prefetched behind layer l).
    ln1_g = ln1_g_ref[0]
    ln1_b = ln1_b_ref[0]
    wqkv = wqkv_ref[0]                    # (D, 3D) bf16, attention scale folded in
    bqkv = bqkv_ref[0]                    # (1, 3D) f32
    wo = wo_ref[0]                        # (D, D) bf16
    bo = bo_ref[0]                        # (1, D) f32
    ln2_g = ln2_g_ref[0]
    ln2_b = ln2_b_ref[0]
    w1 = w1_ref[0]                        # (D, Dh) bf16
    b1 = b1_ref[0]                        # (1, Dh) f32
    w2 = w2_ref[0]                        # (Dh, D) bf16
    b2 = b2_ref[0]                        # (1, D) f32

    # ---- Multi-head self-attention (pre-LN) ----
    h = _layernorm(x, ln1_g, ln1_b)                                    # f32
    qkv = jnp.dot(
        h.astype(jnp.bfloat16), wqkv, preferred_element_type=jnp.float32
    ) + bqkv                                                           # (S_pad, 3D) f32

    # Mask padded key columns (rows >= seq_real are padding tokens).
    key_mask = jax.lax.broadcasted_iota(jnp.int32, (S_pad, S_pad), 1) < seq_real

    for hi in range(num_heads):                                        # static, small
        q = qkv[:, hi * head_dim:(hi + 1) * head_dim].astype(jnp.bfloat16)
        k = qkv[:, D + hi * head_dim:D + (hi + 1) * head_dim].astype(jnp.bfloat16)
        v = qkv[:, 2 * D + hi * head_dim:2 * D + (hi + 1) * head_dim
                ].astype(jnp.bfloat16)
        # q @ k.T without an explicit transpose (contract last dims of both).
        s = jax.lax.dot_general(
            q, k, (((1,), (1,)), ((), ())), preferred_element_type=jnp.float32
        )                                                              # (S_pad, S_pad)
        s = jnp.where(key_mask, s, jnp.float32(-1e30))
        s = s - jnp.max(s, axis=-1, keepdims=True)
        p = jnp.exp(s)
        # EUP reciprocal instead of an (S,S) VALU divide.
        p = p * pl.reciprocal(jnp.sum(p, axis=-1, keepdims=True), approx=True)
        ctx = jnp.dot(
            p.astype(jnp.bfloat16), v, preferred_element_type=jnp.float32
        )                                                              # (S_pad, hd) f32
        # Write this head's context at its static lane offset; the output
        # projection below is then a single K=D MXU GEMM (no per-head f32
        # accumulator read-modify-write traffic).
        ctx_sc[:, hi * head_dim:(hi + 1) * head_dim] = ctx.astype(jnp.bfloat16)

    attn = jnp.dot(ctx_sc[...], wo, preferred_element_type=jnp.float32) + bo
    x = x + attn

    # ---- MLP (pre-LN) ----
    h2 = _layernorm(x, ln2_g, ln2_b)
    h2 = jnp.dot(
        h2.astype(jnp.bfloat16), w1, preferred_element_type=jnp.float32
    ) + b1
    # TODO(synk): timm ViT uses exact erf-GELU; tanh-approx GELU used here.
    h2 = jax.nn.gelu(h2, approximate=True)                             # f32 VPU/EUP
    h2 = jnp.dot(
        h2.astype(jnp.bfloat16), w2, preferred_element_type=jnp.float32
    ) + b2

    o_ref[0] = x + h2


# ----------------------------- wrappers -----------------------------------------


def patch_embed(patches, w, b, *, row_block=512):
    rows, K = patches.shape
    D = w.shape[1]
    rt = min(row_block, rows)          # rt is a multiple of 8 or the full row extent
    return pl.pallas_call(
        patch_embed_kernel,
        out_shape=jax.ShapeDtypeStruct((rows, D), jnp.float32),
        grid=(pl.cdiv(rows, rt),),
        in_specs=[
            pl.BlockSpec((rt, K), lambda i: (i, 0)),
            pl.BlockSpec((K, D), lambda i: (0, 0)),     # constant index: loaded once
            pl.BlockSpec((1, D), lambda i: (0, 0)),
        ],
        out_specs=pl.BlockSpec((rt, D), lambda i: (i, 0)),
        compiler_params=pltpu.CompilerParams(
            dimension_semantics=("parallel",),
            vmem_limit_bytes=_VMEM_LIMIT_BYTES,
        ),
    )(patches, w, b)


def encoder(x_tokens, params, *, num_heads, seq_real):
    """All `depth` transformer layers in a single fused pallas_call.

    grid = (B, depth): batch is 'parallel' (megacore-shardable), layers are the
    innermost 'arbitrary' axis so the residual (the output block) stays in VMEM.
    """
    B, S_pad, D = x_tokens.shape
    depth = params["wqkv"].shape[0]
    Dh = params["w1"].shape[2]
    head_dim = D // num_heads

    kernel = functools.partial(
        encoder_layer_kernel,
        num_heads=num_heads, head_dim=head_dim, seq_real=seq_real,
    )

    def wmap(b, l):                      # per-layer weight blocks
        return (l, 0, 0)

    return pl.pallas_call(
        kernel,
        out_shape=jax.ShapeDtypeStruct((B, S_pad, D), jnp.float32),
        grid=(B, depth),
        in_specs=[
            # Token block: constant across the layer axis -> loaded once per batch.
            pl.BlockSpec((1, S_pad, D), lambda b, l: (b, 0, 0)),
            pl.BlockSpec((1, 1, D), wmap),        # ln1_g
            pl.BlockSpec((1, 1, D), wmap),        # ln1_b
            pl.BlockSpec((1, D, 3 * D), wmap),    # wqkv
            pl.BlockSpec((1, 1, 3 * D), wmap),    # bqkv
            pl.BlockSpec((1, D, D), wmap),        # wo
            pl.BlockSpec((1, 1, D), wmap),        # bo
            pl.BlockSpec((1, 1, D), wmap),        # ln2_g
            pl.BlockSpec((1, 1, D), wmap),        # ln2_b
            pl.BlockSpec((1, D, Dh), wmap),       # w1
            pl.BlockSpec((1, 1, Dh), wmap),       # b1
            pl.BlockSpec((1, Dh, D), wmap),       # w2
            pl.BlockSpec((1, 1, D), wmap),        # b2
        ],
        # Constant index across the layer axis -> residual accumulator in VMEM,
        # written back to HBM only when the batch index changes.
        out_specs=pl.BlockSpec((1, S_pad, D), lambda b, l: (b, 0, 0)),
        scratch_shapes=[pltpu.VMEM((S_pad, D), jnp.bfloat16)],   # per-head ctx slab
        compiler_params=pltpu.CompilerParams(
            dimension_semantics=("parallel", "arbitrary"),
            vmem_limit_bytes=_VMEM_LIMIT_BYTES,
        ),
    )(
        x_tokens,
        params["ln1_g"], params["ln1_b"], params["wqkv"], params["bqkv"],
        params["wo"], params["bo"],
        params["ln2_g"], params["ln2_b"], params["w1"], params["b1"],
        params["w2"], params["b2"],
    )


def vit_forward(x_nchw, params, *, patch, num_heads):
    """Forward pass equivalent to timm ViT with head=Identity -> (B, D) CLS feats."""
    B, C, H, W = x_nchw.shape
    p = patch
    nph, npw = H // p, W // p
    num_patches = nph * npw
    D = params["pos_embed"].shape[-1]

    # Unfold NCHW image into (B*num_patches, C*p*p), (c, i, j)-ordered per patch,
    # matching Conv2d weight (D, C, p, p) flattening.  Cast to bf16 here (fuses
    # with the unavoidable XLA transpose copy, halves patch-embed input DMA).
    patches = x_nchw.reshape(B, C, nph, p, npw, p)
    patches = patches.transpose(0, 2, 4, 1, 3, 5).reshape(B * num_patches, C * p * p)
    patches = patches.astype(jnp.bfloat16)

    tokens = patch_embed(patches, params["patch_w"], params["patch_b"])
    tokens = tokens.reshape(B, num_patches, D)

    cls = jnp.broadcast_to(params["cls_token"], (B, 1, D))
    x = jnp.concatenate([cls, tokens], axis=1) + params["pos_embed"]   # (B, S, D)

    # Pad the sequence to a sublane multiple; padded key columns are masked
    # inside the kernel and padded rows are discarded below.
    S = num_patches + 1
    S_pad = ((S + 7) // 8) * 8
    if S_pad != S:
        x = jnp.pad(x, ((0, 0), (0, S_pad - S), (0, 0)))

    x = encoder(x, params, num_heads=num_heads, seq_real=S)            # (B, S_pad, D)

    cls_tok = x[:, 0, :]                                               # (B, D)
    # Final LayerNorm on tiny (B, D) rows: plain XLA, not worth a pallas_call.
    return _layernorm(cls_tok, params["norm_g"], params["norm_b"])     # (B, D)


# ----------------------------- params -------------------------------------------


def init_params(key, *, C, patch, D, depth, num_heads, mlp_ratio, num_patches):
    Dh = D * mlp_ratio
    S = num_patches + 1
    head_dim = D // num_heads
    attn_scale = head_dim ** -0.5
    keys = list(jax.random.split(key, 3 + 4 * depth))

    def nrm(k, shape, std=0.02):
        return std * jax.random.normal(k, shape, jnp.float32)

    # Per-layer weights stacked along a leading `depth` axis (for the fused
    # layer grid axis).  Matmul weights stored bf16; everything else f32.
    wqkv = jnp.stack([nrm(keys[3 + 4 * i + 0], (D, 3 * D)) for i in range(depth)])
    wo = jnp.stack([nrm(keys[3 + 4 * i + 1], (D, D)) for i in range(depth)])
    w1 = jnp.stack([nrm(keys[3 + 4 * i + 2], (D, Dh)) for i in range(depth)])
    w2 = jnp.stack([nrm(keys[3 + 4 * i + 3], (Dh, D)) for i in range(depth)])
    bqkv = jnp.zeros((depth, 1, 3 * D), jnp.float32)

    # Fold the attention scale (head_dim**-0.5) into the q columns (host-side).
    # NOTE: a torch->jax weight converter must apply the same fold.
    wqkv = wqkv.at[:, :, :D].multiply(attn_scale)
    bqkv = bqkv.at[:, :, :D].multiply(attn_scale)

    return {
        "patch_w": nrm(keys[0], (C * patch * patch, D)).astype(jnp.bfloat16),
        "patch_b": jnp.zeros((1, D), jnp.float32),
        "cls_token": nrm(keys[1], (1, 1, D)),
        "pos_embed": nrm(keys[2], (1, S, D)),
        "norm_g": jnp.ones((1, D), jnp.float32),
        "norm_b": jnp.zeros((1, D), jnp.float32),
        "ln1_g": jnp.ones((depth, 1, D), jnp.float32),
        "ln1_b": jnp.zeros((depth, 1, D), jnp.float32),
        "wqkv": wqkv.astype(jnp.bfloat16),
        "bqkv": bqkv,
        "wo": wo.astype(jnp.bfloat16),
        "bo": jnp.zeros((depth, 1, D), jnp.float32),
        "ln2_g": jnp.ones((depth, 1, D), jnp.float32),
        "ln2_b": jnp.zeros((depth, 1, D), jnp.float32),
        "w1": w1.astype(jnp.bfloat16),
        "b1": jnp.zeros((depth, 1, Dh), jnp.float32),
        "w2": w2.astype(jnp.bfloat16),
        "b2": jnp.zeros((depth, 1, D), jnp.float32),
    }


# ----------------------------- main ----------------------------------------------


if __name__ == "__main__":
    # Small, ViT-consistent smoke-test shapes: 16x16 RGB image, 4x4 patches ->
    # 16 patches (S=17, padded to 24), embed_dim=32, 4 heads, depth=2, mlp_ratio=4.
    # (Toy sizes are for correctness only — perf tuning targets ViT-B:
    # D=768, S=197->200, head_dim=64, depth=12.)
    B, C, H, W = 2, 3, 16, 16
    patch, D, depth, num_heads, mlp_ratio = 4, 32, 2, 4, 4
    num_patches = (H // patch) * (W // patch)

    key = jax.random.PRNGKey(0)
    kx, kp = jax.random.split(key)
    x = jax.random.normal(kx, (B, C, H, W), jnp.float32)
    params = init_params(
        kp, C=C, patch=patch, D=D, depth=depth,
        num_heads=num_heads, mlp_ratio=mlp_ratio, num_patches=num_patches,
    )

    feats = vit_forward(x, params, patch=patch, num_heads=num_heads)
    feats = jax.block_until_ready(feats)
    assert feats.shape == (B, D), feats.shape
    assert feats.dtype == jnp.float32
    assert bool(jnp.all(jnp.isfinite(feats)))
    print("KERNEL_OK")
</pallas_src>

<mosaic_0001>
module attributes {stable_mosaic.version = 11 : i64} {
  func.func @patch_embed_kernel(%arg0: i32, %arg1: memref<32x48xbf16, #tpu.memory_space<vmem>>, %arg2: memref<48x32xbf16, #tpu.memory_space<vmem>>, %arg3: memref<1x32xf32, #tpu.memory_space<vmem>>, %arg4: memref<32x32xf32, #tpu.memory_space<vmem>>) attributes {dimension_semantics = [#tpu.dimension_semantics<parallel>], iteration_bounds = array<i64: 1>, scalar_prefetch = 0 : i64, scratch_operands = 0 : i64, tpu.core_type = #tpu.core_type<tc>, window_params = [{transform_indices = @transform_0, window_bounds = array<i64: 32, 48>}, {pipeline_mode = #tpu.pipeline_mode<synchronous>, transform_indices = @transform_1, window_bounds = array<i64: 48, 32>}, {pipeline_mode = #tpu.pipeline_mode<synchronous>, transform_indices = @transform_2, window_bounds = array<i64: 1, 32>}, {transform_indices = @transform_3, window_bounds = array<i64: 32, 32>}]} {
    %c0 = arith.constant 0 : index
    %c0_0 = arith.constant 0 : index
    %0 = vector.load %arg1[%c0, %c0_0] : memref<32x48xbf16, #tpu.memory_space<vmem>>, vector<32x48xbf16>
    %c0_1 = arith.constant 0 : index
    %c0_2 = arith.constant 0 : index
    %1 = vector.load %arg2[%c0_1, %c0_2] : memref<48x32xbf16, #tpu.memory_space<vmem>>, vector<48x32xbf16>
    %cst = arith.constant dense<0.000000e+00> : vector<32x32xf32>
    %2 = tpu.matmul %0, %1, %cst {dimension_numbers = #tpu.dot_dimension_numbers<[1], [0], [0], [1], [0, 0, 1, 1], [], []>} : vector<32x48xbf16>, vector<48x32xbf16>, vector<32x32xf32> -> vector<32x32xf32>
    %c0_3 = arith.constant 0 : index
    %c0_4 = arith.constant 0 : index
    %3 = vector.load %arg3[%c0_3, %c0_4] : memref<1x32xf32, #tpu.memory_space<vmem>>, vector<1x32xf32>
    %4 = vector.broadcast %3 : vector<1x32xf32> to vector<32x32xf32>
    %5 = arith.addf %2, %4 : vector<32x32xf32>
    %c0_5 = arith.constant 0 : index
    %c0_6 = arith.constant 0 : index
    %6 = vector.load %arg4[%c0_5, %c0_6] : memref<32x32xf32, #tpu.memory_space<vmem>>, vector<32x32xf32>
    tpu.vector_store %arg4[%c0_5, %c0_6], %5 {strides = array<i32>} : memref<32x32xf32, #tpu.memory_space<vmem>>, vector<32x32xf32>,
    return
  }
  func.func @transform_0(%arg0: i32) -> (i32, i32) {
    %c0_i32 = arith.constant 0 : i32
    %c0_i32_0 = arith.constant 0 : i32
    return %arg0, %c0_i32 : i32, i32
  }
  func.func @transform_1(%arg0: i32) -> (i32, i32) {
    %c0_i32 = arith.constant 0 : i32
    %c0_i32_0 = arith.constant 0 : i32
    %c0_i32_1 = arith.constant 0 : i32
    return %c0_i32, %c0_i32_0 : i32, i32
  }
  func.func @transform_2(%arg0: i32) -> (i32, i32) {
    %c0_i32 = arith.constant 0 : i32
    %c0_i32_0 = arith.constant 0 : i32
    %c0_i32_1 = arith.constant 0 : i32
    return %c0_i32, %c0_i32_0 : i32, i32
  }
  func.func @transform_3(%arg0: i32) -> (i32, i32) {
    %c0_i32 = arith.constant 0 : i32
    %c0_i32_0 = arith.constant 0 : i32
    return %arg0, %c0_i32 : i32, i32
  }
}

</mosaic_0001>

<bundles_post_ra>
// kernel: tpu_custom_call.1
= control target key start
LH: loop header
LB: loop body
LE: loop exit
PB: predicated region body
PF: predicated region fallthrough
CT: control target
= control target key end

     0   :  { %s215_s0 = inlined_call_operand.vmem [shape: bf16[32,48], index: 0, kind: input, shape index: {}]   ;;  %s216_s1 = inlined_call_operand.vmem [shape: bf16[48,32], index: 1, kind: input, shape index: {}]   ;;  %s217_s2 = inlined_call_operand.vmem [shape: f32[1,32], index: 2, kind: input, shape index: {}]   ;;  %s218_s3 = inlined_call_operand.hbm [shape: f32[32,32], index: 3, kind: output, shape index: {}]  }
   0x1   :  { %v133_v0 = vld [vmem:[%s216_s1 + $0x10] sm:$0xff]  ;;  %v132_v1 = vld [vmem:[%s216_s1 + $0x8] sm:$0xff] }
   0x2   :  { %70 = vmatpush.bf16.msra.mxu0 %v133_v0  ;;  %134 = vmatpush.bf16.msra.mxu1 %v133_v0 }
   0x3   :  { %8 = vsyncpa [#allocation3], 0  ;;  %v131_v2 = vld [vmem:[%s216_s1] sm:$0xff]  ;;  %v130_v4 = vld [vmem:[%s215_s0 + $0x8] sm:$0xff]  ;;  %vm58_vm0 = vcmask 392192   ;;  %vm84_vm1 = vcmask 261120  }
   0x4   :  { %v129_v3 = vld [vmem:[%s215_s0] sm:$0xff]  ;;  %s167_s1 = smov [#allocation2]   ;;  %s95_s26 = sshll.u32 %s218_s3, 4  ;;  %s96_s26 = int_to_ptr.hbm [resolvable:$true] %s95_s26 }
   0x5   :  { %v140_v5 = vld [vmem:[%s217_s2] ss:$0 sm:$0xff]  ;;  %s93_s0 = sshll.u32 %s167_s1, 4  ;;  %s168_s2 = smov 128   ;;  %s94_s0 = int_to_ptr.vmem [resolvable:$true] %s93_s0 }
   0x6   :  { %71 = vmatpush.bf16.msra.mxu0 %v132_v1  ;;  %135 = vmatpush.bf16.msra.mxu1 %v132_v1  ;;  %s169_s27 = smov 8  }
   0xa   :  { %72 = vmatpush.bf16.msra.mxu0 %v131_v2  ;;  %136 = vmatpush.bf16.msra.mxu1 %v131_v2 }
   0xd   :  { %127 = vmatmul.msk.bf16.vlgmr.msra.gmra.mxu0 %vm58_vm0, %v129_v3  ;;  %128 = vmatmul.msk.bf16.vlgmr.msra.gmra.mxu1 %vm58_vm0, %v130_v4 }
  0x8a   :  { %v74_v6 = vpop.f32.mrf.mxu0  ;;  %v79_v7 = vpop.f32.mrf.mxu1 }
  0x8b   :  { %v75_v8 = vadd.f32 %v140_v5, %v74_v6  ;;  %v80_v9 = vadd.f32 %v140_v5, %v79_v7 }
  0x8d   :  { %85 = vst.msk [vmem:[#allocation2] sm:$0xff] %vm84_vm1, %v75_v8 }
  0x8e   :  { %87 = vst.msk [vmem:[#allocation2 + $0x10] sm:$0xff] %vm84_vm1, %v80_v9 }
  0x92   :  { %v76_v10 = vpop.f32.mrf.mxu0  ;;  %v81_v11 = vpop.f32.mrf.mxu1 }
  0x93   :  { %v77_v12 = vadd.f32 %v140_v5, %v76_v10  ;;  %v82_v13 = vadd.f32 %v140_v5, %v81_v11 }
  0x95   :  { %86 = vst.msk [vmem:[#allocation2 + $0x8] sm:$0xff] %vm84_vm1, %v77_v12 }
  0x96   :  { %88 = vst.msk [vmem:[#allocation2 + $0x18] sm:$0xff] %vm84_vm1, %v82_v13 }
  0x97   :  { %101 = dma.vmem_to_hbm [thread:$0]  %s94_s0, 512, %s96_s26, [#allocation3], %s168_s2, %s168_s2, %s169_s27  }
  0x98   :  { %165 = dma.done.wait [#allocation3], 512  }
  0x99   :  { %166 = vsyncadd [#allocation3], 4294966784 }
  0x9a   :  { %106 = vsyncpa [#allocation3], 1 }

</bundles_post_ra>
